<compile_context>
chip_gen: v5e
topology: v5e:2x2
jax: 0.10.0
libtpu: 0.0.40
codegen_flags: <defaults>
</compile_context>

<pallas_src>
import jax
import jax.numpy as jnp
from jax.experimental import pallas as pl
from jax.experimental.pallas import tpu as pltpu


_LANE = 128
_SUBLANE = 8
# ~2 MiB per block -> ~8 MiB VMEM with double-buffered in+out specs.
_TARGET_BLOCK_BYTES = 2 * 1024 * 1024


def _copy_kernel(z_ref, o_ref):
    # Pure identity: forward() returns the parameter as-is.
    o_ref[...] = z_ref[...]


def latent_z_forward(z: jax.Array) -> jax.Array:
    """Pallas implementation of LatentZ.forward(): returns a copy of z.

    (In production the cheapest forward is simply `return z`; this kernel
    exists to exercise the Pallas copy path with a lane-dense layout.)
    """
    orig_shape = z.shape
    total = z.size
    if total == 0:
        return z

    itemsize = jnp.dtype(z.dtype).itemsize

    if total % _LANE != 0:
        # Oddly-sized latent: whole-array single-block copy. Full-extent block
        # dims satisfy the tiling rule via the full-dimension exception.
        flat = z.reshape(1, total)
        out = pl.pallas_call(
            _copy_kernel,
            out_shape=jax.ShapeDtypeStruct(flat.shape, flat.dtype),
            grid_spec=pltpu.PrefetchScalarGridSpec(
                num_scalar_prefetch=0,
                grid=(1,),
                in_specs=[pl.BlockSpec((1, total), lambda i: (0, 0))],
                out_specs=pl.BlockSpec((1, total), lambda i: (0, 0)),
            ),
            compiler_params=pltpu.CompilerParams(
                dimension_semantics=("arbitrary",),
            ),
        )(flat)
        return out.reshape(orig_shape)

    # Lane-dense 2D view: last dim exactly one vreg lane width.
    rows = total // _LANE
    x2d = z.reshape(rows, _LANE)

    bytes_per_row = _LANE * itemsize
    max_rows = max(_SUBLANE, _TARGET_BLOCK_BYTES // bytes_per_row)

    if rows <= max_rows:
        # Whole tensor in one shot: single grid step, full-extent block.
        block_rows = rows
        grid = (1,)
    else:
        # Large latent: ~2 MiB blocks, rows rounded to a sublane multiple.
        block_rows = (max_rows // _SUBLANE) * _SUBLANE
        grid = (pl.cdiv(rows, block_rows),)

    out2d = pl.pallas_call(
        _copy_kernel,
        out_shape=jax.ShapeDtypeStruct((rows, _LANE), z.dtype),
        grid_spec=pltpu.PrefetchScalarGridSpec(
            num_scalar_prefetch=0,
            grid=grid,
            in_specs=[pl.BlockSpec((block_rows, _LANE), lambda i: (i, 0))],
            out_specs=pl.BlockSpec((block_rows, _LANE), lambda i: (i, 0)),
        ),
        compiler_params=pltpu.CompilerParams(
            dimension_semantics=("arbitrary",),
        ),
    )(x2d)
    return out2d.reshape(orig_shape)


class LatentZ:
    """JAX/Pallas port of the PyTorch LatentZ module."""

    def __init__(self, init_val: jax.Array):
        self.z = jnp.asarray(init_val)

    def forward(self) -> jax.Array:
        # Fastest possible forward would be `return self.z` (identity, zero
        # HBM traffic); we route through the Pallas copy kernel to exercise it.
        return latent_z_forward(self.z)

    def reinit(self, init_val: jax.Array):
        self.z = jnp.asarray(init_val)


if __name__ == "__main__":
    key = jax.random.PRNGKey(0)
    # Small NCHW latent: batch=2, channels=4, spatial=16x16.
    init_val = jax.random.normal(key, (2, 4, 16, 16), dtype=jnp.float32)

    module = LatentZ(init_val)
    out = module.forward()
    out = jax.block_until_ready(out)

    assert out.shape == init_val.shape
    assert out.dtype == init_val.dtype
    assert bool(jnp.all(out == init_val))

    print("KERNEL_OK")
</pallas_src>

<mosaic_0001>
module attributes {stable_mosaic.version = 11 : i64} {
  func.func @_copy_kernel(%arg0: i32, %arg1: memref<16x128xf32, #tpu.memory_space<vmem>>, %arg2: memref<16x128xf32, #tpu.memory_space<vmem>>) attributes {dimension_semantics = [#tpu.dimension_semantics<arbitrary>], iteration_bounds = array<i64: 1>, scalar_prefetch = 0 : i64, scratch_operands = 0 : i64, tpu.core_type = #tpu.core_type<tc>, window_params = [{transform_indices = @transform_0, window_bounds = array<i64: 16, 128>}, {transform_indices = @transform_1, window_bounds = array<i64: 16, 128>}]} {
    %c0 = arith.constant 0 : index
    %c0_0 = arith.constant 0 : index
    %0 = vector.load %arg1[%c0, %c0_0] : memref<16x128xf32, #tpu.memory_space<vmem>>, vector<16x128xf32>
    %c0_1 = arith.constant 0 : index
    %c0_2 = arith.constant 0 : index
    %1 = vector.load %arg2[%c0_1, %c0_2] : memref<16x128xf32, #tpu.memory_space<vmem>>, vector<16x128xf32>
    tpu.vector_store %arg2[%c0_1, %c0_2], %0 {strides = array<i32>} : memref<16x128xf32, #tpu.memory_space<vmem>>, vector<16x128xf32>,
    return
  }
  func.func @transform_0(%arg0: i32) -> (i32, i32) {
    %c0_i32 = arith.constant 0 : i32
    %c0_i32_0 = arith.constant 0 : i32
    return %arg0, %c0_i32 : i32, i32
  }
  func.func @transform_1(%arg0: i32) -> (i32, i32) {
    %c0_i32 = arith.constant 0 : i32
    %c0_i32_0 = arith.constant 0 : i32
    return %arg0, %c0_i32 : i32, i32
  }
}

</mosaic_0001>

<bundles_post_ra>
// kernel: tpu_custom_call.1
= control target key start
LH: loop header
LB: loop body
LE: loop exit
PB: predicated region body
PF: predicated region fallthrough
CT: control target
= control target key end

     0   :  { %6 = vsyncpa [#allocation3], 0  ;;  %s124_s0 = inlined_call_operand.hbm [shape: f32[16,128], index: 0, kind: input, shape index: {}]   ;;  %s125_s1 = inlined_call_operand.hbm [shape: f32[16,128], index: 1, kind: output, shape index: {}]  }
   0x1   :  { %7 = vsyncpa [#allocation4], 0  ;;  %s12_s8 = sshll.u32 %s124_s0, 4  ;;  %s104_s9 = smov [#allocation2]   ;;  %s13_s8 = int_to_ptr.hbm [resolvable:$true] %s12_s8 }
   0x2   :  { %s14_s10 = sshll.u32 %s104_s9, 4  ;;  %s105_s11 = smov 128   ;;  %s15_s10 = int_to_ptr.vmem [resolvable:$true] %s14_s10 }
   0x3   :  { %s106_s12 = smov 8  }
   0x4   :  { %20 = dma.hbm_to_vmem [thread:$0]  %s13_s8, 256, %s15_s10, [#allocation3], %s105_s11, %s105_s11, %s106_s12  }
   0x5   :  { %100 = dma.done.wait [#allocation3], 256  }
   0x6   :  { %101 = vsyncadd [#allocation3], 4294967040  ;;  %s107_s13 = smov [#allocation5]   ;;  %s35_s17 = sshll.u32 %s125_s1, 4  ;;  %v25_v0 = vld [vmem:[#allocation2] sm:$0xff]  ;;  %v26_v1 = vld [vmem:[#allocation2 + $0x8] sm:$0xff]  ;;  %s36_s17 = int_to_ptr.hbm [resolvable:$true] %s35_s17 }
   0x7   :  { %s33_s14 = sshll.u32 %s107_s13, 4  ;;  %27 = vst [vmem:[#allocation5] sm:$0xff] %v25_v0  ;;  %s34_s14 = int_to_ptr.vmem [resolvable:$true] %s33_s14 }
   0x8   :  { %28 = vst [vmem:[#allocation5 + $0x8] sm:$0xff] %v26_v1 }
   0x9   :  { %41 = dma.vmem_to_hbm [thread:$0]  %s34_s14, 256, %s36_s17, [#allocation4], %s105_s11, %s105_s11, %s106_s12  }
   0xa   :  { %102 = dma.done.wait [#allocation4], 256  }
   0xb   :  { %103 = vsyncadd [#allocation4], 4294967040 }
   0xc   :  { %46 = vsyncpa [#allocation3], 1 }
   0xd   :  { %47 = vsyncpa [#allocation4], 1 }

</bundles_post_ra>
